<compile_context>
chip_gen: v6e
topology: v6e:2x2x1
jax: 0.10.0
libtpu: 0.0.40
codegen_flags: <defaults>
</compile_context>

<pallas_src>
import functools

import jax
import jax.numpy as jnp
from jax.experimental import pallas as pl
from jax.experimental.pallas import tpu as pltpu

_LANE = 128


def _round_up(x, m):
    return -(-x // m) * m


def _vmem_capacity_bytes():
    """Physical VMEM per TensorCore (64 MiB on v7x, 128 MiB on v5e/v6e)."""
    try:
        return int(pltpu.get_tpu_info().vmem_capacity_bytes)
    except Exception:
        return 64 << 20  # conservative fallback (v7x-sized)


def _pick_seq_tile(S, H, itemsize, vmem_bytes, batch):
    """Sequence-tile rows: largest multiple of 8 within the x-tile budget."""
    budget_rows = max(8, (vmem_bytes // 16) // max(1, H * itemsize))
    row_cap = 1024 if vmem_bytes >= (96 << 20) else 512
    t = min(S, budget_rows, row_cap)
    if t >= S:
        # Guarantee >= 2 sequence tiles when batch == 1 so both TensorCores
        # (v7x megacore) get work along the parallel grid axes.
        if batch == 1 and S >= 16:
            return min(S, max(8, _round_up((S + 1) // 2, 8)))
        return S
    return max(8, t - (t % 8))


def _pick_out_tile(O_pad, H, w_itemsize, vmem_bytes):
    """Output-column tile.

    Prefer the full padded width (single N tile -> weight DMA'd once);
    otherwise the largest 256/128-multiple divisor within the weight budget.
    """
    budget_cols = max(
        _LANE, ((vmem_bytes // 6) // max(1, H * w_itemsize)) // _LANE * _LANE)
    if O_pad <= budget_cols:
        return O_pad
    step = 256 if O_pad % 256 == 0 else _LANE  # feed the full 256-wide MXU
    start = budget_cols - (budget_cols % step)
    for t in range(start, step - 1, -step):
        if O_pad % t == 0:
            return t
    return _LANE  # O_pad is always a multiple of 128


def _ddit_final_kernel(x_ref, mod_ref, w_ref, b_ref, o_ref, *,
                       hidden_size, eps, matmul_dtype):
    """Fused LayerNorm + modulate + linear for one (batch, n-tile, seq-tile)."""
    H = hidden_size
    x = x_ref[...].astype(jnp.float32)                       # (tS, H)

    # Single-pass LayerNorm statistics (one sweep, two XLU reductions).
    inv_h = jnp.float32(1.0 / H)
    s1 = jnp.sum(x, axis=-1, keepdims=True)
    s2 = jnp.sum(x * x, axis=-1, keepdims=True)
    mean = s1 * inv_h
    var = jnp.maximum(s2 * inv_h - mean * mean, 0.0)
    inv_std = jax.lax.rsqrt(var + eps)

    mod = mod_ref[...]                                        # (1, 2H) f32
    cscale = mod[:, :H]                                       # ln_w * (1 + scale)
    cshift = mod[:, H:]                                       # shift
    xn = ((x - mean) * inv_std) * cscale + cshift             # modulate_fused

    # Final projection on the MXU, f32 accumulation.
    out = jnp.dot(xn.astype(matmul_dtype), w_ref[...],
                  preferred_element_type=jnp.float32)          # (tS, tN)
    o_ref[...] = (out + b_ref[...]).astype(o_ref.dtype)


def prepare_final_linear(w_lin, b_lin, *, matmul_dtype):
    """One-time weight prep: transpose to (H, O), pad O to a 128-lane multiple,
    cast to the matmul dtype. Call once at parameter-setup time."""
    O, _ = w_lin.shape
    O_pad = _round_up(O, _LANE)
    w_t = jnp.transpose(w_lin).astype(matmul_dtype)            # (H, O)
    b = b_lin.astype(jnp.float32)
    if O_pad != O:
        w_t = jnp.pad(w_t, ((0, 0), (0, O_pad - O)))
        b = jnp.pad(b, (0, O_pad - O))
    return w_t, b.reshape(1, O_pad), O


def ddit_final_layer(x, c, ln_weight, w_ada=None, b_ada=None,
                     w_lin=None, b_lin=None, *, adaLN=True, eps=1e-5,
                     matmul_dtype=None, prepared_linear=None,
                     return_padded=False):
    """Pallas implementation of DDiTFinalLayer.forward.

    x        : [B, S, H]
    c        : [B, C]           (ignored when adaLN=False)
    ln_weight: [H]              (LayerNorm scale)
    w_ada    : [2H, C], b_ada: [2H]   (torch layout, adaLN branch)
    w_lin    : [O, H],  b_lin: [O]    (torch layout), or pass prepared_linear
    matmul_dtype : dtype for the MXU operands (set jnp.bfloat16 for the fast
                   path on f32 models; accumulation stays f32).
    """
    B, S, H = x.shape
    if matmul_dtype is None:
        matmul_dtype = x.dtype
    if prepared_linear is None:
        prepared_linear = prepare_final_linear(
            w_lin, b_lin, matmul_dtype=matmul_dtype)
    w_lin_t, b_lin_row, O = prepared_linear
    O_pad = w_lin_t.shape[1]

    # ---- host-side prep: adaLN matmul hoisted; ln_weight folded in ----------
    ln_w = ln_weight.astype(jnp.float32)
    if adaLN:
        ada = (c.astype(jnp.float32)
               @ jnp.transpose(w_ada).astype(jnp.float32)
               + b_ada.astype(jnp.float32))                    # (B, 2H)
        shift, scale = ada[:, :H], ada[:, H:]
        cscale = ln_w[None, :] * (1.0 + scale)
        mod = jnp.concatenate([cscale, shift], axis=-1)        # (B, 2H)
    else:
        mod = jnp.concatenate(
            [jnp.broadcast_to(ln_w, (B, H)),
             jnp.zeros((B, H), jnp.float32)], axis=-1)
    mod = mod.reshape(B, 1, 2 * H)

    # ---- generation-aware tiling / VMEM budget -------------------------------
    hw_vmem = _vmem_capacity_bytes()
    x_isz = jnp.dtype(x.dtype).itemsize
    w_isz = jnp.dtype(matmul_dtype).itemsize
    tS = _pick_seq_tile(S, H, x_isz, hw_vmem, B)
    tN = _pick_out_tile(O_pad, H, w_isz, hw_vmem)
    n_s = pl.cdiv(S, tS)          # ragged last seq tile is masked by Pallas
    n_n = O_pad // tN
    # Weight-stationary grid: the weight block index only changes with `n`.
    grid = (B, n_n, n_s)

    est_vmem = (2 * tS * H * x_isz          # x tiles (double-buffered)
                + 2 * tS * tN * x_isz       # output tiles
                + 2 * H * tN * w_isz        # weight tile
                + 2 * (2 * H + tN) * 4)     # mod + bias
    vmem_limit = int(min(hw_vmem - (8 << 20),
                         max(32 << 20, est_vmem + (8 << 20))))

    w_fetches = B * n_n if n_n > 1 else 1   # constant block index => one DMA
    cost = pl.CostEstimate(
        flops=int(2 * B * S * H * O_pad + 8 * B * S * H * n_n),
        transcendentals=int(B * S * n_n),
        bytes_accessed=int(n_n * B * S * H * x_isz       # x re-read per N tile
                           + B * S * O_pad * x_isz       # output
                           + w_fetches * H * O_pad * w_isz
                           + B * 2 * H * 4 + O_pad * 4),
    )

    kernel = functools.partial(_ddit_final_kernel, hidden_size=H, eps=eps,
                               matmul_dtype=matmul_dtype)

    out = pl.pallas_call(
        kernel,
        out_shape=jax.ShapeDtypeStruct((B, S, O_pad), x.dtype),
        grid_spec=pltpu.PrefetchScalarGridSpec(
            num_scalar_prefetch=0,
            grid=grid,
            in_specs=[
                # activations: (tS, H) slab, re-streamed only when n_n > 1
                pl.BlockSpec((pl.Squeezed(), tS, H), lambda b, n, s: (b, s, 0)),
                # per-batch fused scale/shift row (f32)
                pl.BlockSpec((pl.Squeezed(), 1, 2 * H),
                             lambda b, n, s: (b, 0, 0)),
                # projection weight tile (index constant when n_n == 1)
                pl.BlockSpec((H, tN), lambda b, n, s: (0, n)),
                # bias row (f32)
                pl.BlockSpec((1, tN), lambda b, n, s: (0, n)),
            ],
            out_specs=pl.BlockSpec((pl.Squeezed(), tS, tN),
                                   lambda b, n, s: (b, s, n)),
        ),
        compiler_params=pltpu.CompilerParams(
            # Kernel is stateless and every output block is written exactly
            # once, so all grid axes may be sharded across TensorCores.
            dimension_semantics=("parallel", "parallel", "parallel"),
            vmem_limit_bytes=vmem_limit),
        cost_estimate=cost,
    )(x, mod, w_lin_t, b_lin_row)

    if O_pad != O and not return_padded:
        # NOTE: this slice is a full extra HBM read+write of the output; pass
        # return_padded=True and consume the padded tensor to avoid it.
        out = out[..., :O]
    return out


# ------------------------------ reference ------------------------------------
def _reference(x, c, ln_weight, w_ada, b_ada, w_lin, b_lin, adaLN=True,
               eps=1e-5):
    xf = x.astype(jnp.float32)
    mean = jnp.mean(xf, axis=-1, keepdims=True)
    var = jnp.mean((xf - mean) ** 2, axis=-1, keepdims=True)
    xn = (xf - mean) * jax.lax.rsqrt(var + eps) * ln_weight[None, None, :]
    if adaLN:
        H = x.shape[-1]
        ada = c @ w_ada.T + b_ada                     # (B, 2H)
        shift = ada[:, None, :H]
        scale = ada[:, None, H:]
        xn = xn * (1.0 + scale) + shift
    return xn @ w_lin.T + b_lin


if __name__ == "__main__":
    B, S, H, C, O = 2, 8, 32, 16, 4   # batch, seq, hidden_size, cond_dim, out

    key = jax.random.PRNGKey(0)
    kx, kc, kln, kwa, kba, kwl, kbl = jax.random.split(key, 7)

    x = jax.random.normal(kx, (B, S, H), dtype=jnp.float32)
    c = jax.random.normal(kc, (B, C), dtype=jnp.float32)

    # The module zero-inits linear/adaLN weights; use small random values so
    # the kernel computation is non-trivial.
    ln_weight = 1.0 + 0.1 * jax.random.normal(kln, (H,), dtype=jnp.float32)
    w_ada = 0.05 * jax.random.normal(kwa, (2 * H, C), dtype=jnp.float32)
    b_ada = 0.05 * jax.random.normal(kba, (2 * H,), dtype=jnp.float32)
    w_lin = 0.05 * jax.random.normal(kwl, (O, H), dtype=jnp.float32)
    b_lin = 0.05 * jax.random.normal(kbl, (O,), dtype=jnp.float32)

    # One-time weight prep (kept out of the per-call hot path).
    prep_f32 = prepare_final_linear(w_lin, b_lin, matmul_dtype=jnp.float32)

    # --- adaLN=True, f32 matmul path ---
    out = ddit_final_layer(x, c, ln_weight, w_ada, b_ada,
                           adaLN=True, prepared_linear=prep_f32)
    out = jax.block_until_ready(out)
    ref = _reference(x, c, ln_weight, w_ada, b_ada, w_lin, b_lin, adaLN=True)
    assert out.shape == (B, S, O)
    assert jnp.allclose(out, ref, atol=1e-4, rtol=1e-4), "adaLN f32 mismatch"

    # --- adaLN=False path ---
    out_na = ddit_final_layer(x, c, ln_weight, None, None,
                              adaLN=False, prepared_linear=prep_f32)
    out_na = jax.block_until_ready(out_na)
    ref_na = _reference(x, c, ln_weight, w_ada, b_ada, w_lin, b_lin,
                        adaLN=False)
    assert jnp.allclose(out_na, ref_na, atol=1e-4, rtol=1e-4), \
        "no-adaLN mismatch"

    # --- bf16 MXU fast path (widened tolerance) ---
    prep_bf16 = prepare_final_linear(w_lin, b_lin, matmul_dtype=jnp.bfloat16)
    out_bf = ddit_final_layer(x, c, ln_weight, w_ada, b_ada,
                              adaLN=True, matmul_dtype=jnp.bfloat16,
                              prepared_linear=prep_bf16)
    out_bf = jax.block_until_ready(out_bf)
    assert jnp.allclose(out_bf, ref, atol=1e-1, rtol=1e-1), "bf16 mismatch"

    print("KERNEL_OK")
</pallas_src>

<mosaic_0001>
module attributes {stable_mosaic.version = 11 : i64} {
  func.func @_ddit_final_kernel(%arg0: i32, %arg1: i32, %arg2: i32, %arg3: memref<1x8x32xf32, #tpu.memory_space<vmem>>, %arg4: memref<1x1x64xf32, #tpu.memory_space<vmem>>, %arg5: memref<32x128xf32, #tpu.memory_space<vmem>>, %arg6: memref<1x128xf32, #tpu.memory_space<vmem>>, %arg7: memref<1x8x128xf32, #tpu.memory_space<vmem>>) attributes {dimension_semantics = [#tpu.dimension_semantics<parallel>, #tpu.dimension_semantics<parallel>, #tpu.dimension_semantics<parallel>], iteration_bounds = array<i64: 2, 1, 1>, scalar_prefetch = 0 : i64, scratch_operands = 0 : i64, tpu.core_type = #tpu.core_type<tc>, window_params = [{transform_indices = @transform_0, window_bounds = array<i64: 1, 8, 32>}, {transform_indices = @transform_1, window_bounds = array<i64: 1, 1, 64>}, {transform_indices = @transform_2, window_bounds = array<i64: 32, 128>}, {transform_indices = @transform_3, window_bounds = array<i64: 1, 128>}, {transform_indices = @transform_4, window_bounds = array<i64: 1, 8, 128>}]} {
    %c0 = arith.constant 0 : index
    %c0_0 = arith.constant 0 : index
    %c0_1 = arith.constant 0 : index
    %0 = vector.load %arg3[%c0, %c0_0, %c0_1] : memref<1x8x32xf32, #tpu.memory_space<vmem>>, vector<1x8x32xf32>
    %1 = vector.shape_cast %0 : vector<1x8x32xf32> to vector<8x32xf32>
    %cst = arith.constant dense<0.000000e+00> : vector<8xf32>
    %2 = vector.multi_reduction <add>, %1, %cst [1] : vector<8x32xf32> to vector<8xf32>
    %3 = vector.shape_cast %2 : vector<8xf32> to vector<8x1xf32>
    %4 = arith.mulf %1, %1 : vector<8x32xf32>
    %cst_2 = arith.constant dense<0.000000e+00> : vector<8xf32>
    %5 = vector.multi_reduction <add>, %4, %cst_2 [1] : vector<8x32xf32> to vector<8xf32>
    %6 = vector.shape_cast %5 : vector<8xf32> to vector<8x1xf32>
    %cst_3 = arith.constant 3.125000e-02 : f32
    %7 = vector.broadcast %cst_3 : f32 to vector<8x1xf32>
    %8 = arith.mulf %3, %7 : vector<8x1xf32>
    %cst_4 = arith.constant 3.125000e-02 : f32
    %9 = vector.broadcast %cst_4 : f32 to vector<8x1xf32>
    %10 = arith.mulf %6, %9 : vector<8x1xf32>
    %11 = arith.mulf %8, %8 : vector<8x1xf32>
    %12 = arith.subf %10, %11 : vector<8x1xf32>
    %cst_5 = arith.constant 0.000000e+00 : f32
    %13 = vector.broadcast %cst_5 : f32 to vector<8x1xf32>
    %14 = arith.maximumf %12, %13 : vector<8x1xf32>
    %cst_6 = arith.constant 9.99999974E-6 : f32
    %15 = vector.broadcast %cst_6 : f32 to vector<8x1xf32>
    %16 = arith.addf %14, %15 : vector<8x1xf32>
    %17 = math.rsqrt %16 : vector<8x1xf32>
    %c0_7 = arith.constant 0 : index
    %c0_8 = arith.constant 0 : index
    %c0_9 = arith.constant 0 : index
    %18 = vector.load %arg4[%c0_7, %c0_8, %c0_9] : memref<1x1x64xf32, #tpu.memory_space<vmem>>, vector<1x1x64xf32>
    %19 = vector.shape_cast %18 : vector<1x1x64xf32> to vector<1x64xf32>
    %20 = vector.extract_strided_slice %19 {offsets = [0, 0], sizes = [1, 32], strides = [1, 1]} : vector<1x64xf32> to vector<1x32xf32>
    %21 = vector.extract_strided_slice %19 {offsets = [0, 32], sizes = [1, 32], strides = [1, 1]} : vector<1x64xf32> to vector<1x32xf32>
    %22 = vector.broadcast %8 : vector<8x1xf32> to vector<8x32xf32>
    %23 = arith.subf %1, %22 : vector<8x32xf32>
    %24 = vector.broadcast %17 : vector<8x1xf32> to vector<8x32xf32>
    %25 = arith.mulf %23, %24 : vector<8x32xf32>
    %26 = vector.broadcast %20 : vector<1x32xf32> to vector<8x32xf32>
    %27 = arith.mulf %25, %26 : vector<8x32xf32>
    %28 = vector.broadcast %21 : vector<1x32xf32> to vector<8x32xf32>
    %29 = arith.addf %27, %28 : vector<8x32xf32>
    %c0_10 = arith.constant 0 : index
    %c0_11 = arith.constant 0 : index
    %30 = vector.load %arg5[%c0_10, %c0_11] : memref<32x128xf32, #tpu.memory_space<vmem>>, vector<32x128xf32>
    %cst_12 = arith.constant dense<0.000000e+00> : vector<8x128xf32>
    %31 = tpu.matmul %29, %30, %cst_12 {dimension_numbers = #tpu.dot_dimension_numbers<[1], [0], [0], [1], [0, 0, 1, 1], [], []>} : vector<8x32xf32>, vector<32x128xf32>, vector<8x128xf32> -> vector<8x128xf32>
    %c0_13 = arith.constant 0 : index
    %c0_14 = arith.constant 0 : index
    %32 = vector.load %arg6[%c0_13, %c0_14] : memref<1x128xf32, #tpu.memory_space<vmem>>, vector<1x128xf32>
    %33 = vector.broadcast %32 : vector<1x128xf32> to vector<8x128xf32>
    %34 = arith.addf %31, %33 : vector<8x128xf32>
    %c0_15 = arith.constant 0 : index
    %c0_16 = arith.constant 0 : index
    %c0_17 = arith.constant 0 : index
    %35 = vector.load %arg7[%c0_15, %c0_16, %c0_17] : memref<1x8x128xf32, #tpu.memory_space<vmem>>, vector<1x8x128xf32>
    %36 = vector.shape_cast %35 : vector<1x8x128xf32> to vector<8x128xf32>
    %37 = vector.shape_cast %34 : vector<8x128xf32> to vector<1x8x128xf32>
    tpu.vector_store %arg7[%c0_15, %c0_16, %c0_17], %37 {strides = array<i32>} : memref<1x8x128xf32, #tpu.memory_space<vmem>>, vector<1x8x128xf32>,
    return
  }
  func.func @transform_0(%arg0: i32, %arg1: i32, %arg2: i32) -> (i32, i32, i32) {
    %c0_i32 = arith.constant 0 : i32
    %c0_i32_0 = arith.constant 0 : i32
    return %arg0, %arg2, %c0_i32 : i32, i32, i32
  }
  func.func @transform_1(%arg0: i32, %arg1: i32, %arg2: i32) -> (i32, i32, i32) {
    %c0_i32 = arith.constant 0 : i32
    %c0_i32_0 = arith.constant 0 : i32
    %c0_i32_1 = arith.constant 0 : i32
    return %arg0, %c0_i32, %c0_i32_0 : i32, i32, i32
  }
  func.func @transform_2(%arg0: i32, %arg1: i32, %arg2: i32) -> (i32, i32) {
    %c0_i32 = arith.constant 0 : i32
    %c0_i32_0 = arith.constant 0 : i32
    return %c0_i32, %arg1 : i32, i32
  }
  func.func @transform_3(%arg0: i32, %arg1: i32, %arg2: i32) -> (i32, i32) {
    %c0_i32 = arith.constant 0 : i32
    %c0_i32_0 = arith.constant 0 : i32
    return %c0_i32, %arg1 : i32, i32
  }
  func.func @transform_4(%arg0: i32, %arg1: i32, %arg2: i32) -> (i32, i32, i32) {
    %c0_i32 = arith.constant 0 : i32
    return %arg0, %arg2, %arg1 : i32, i32, i32
  }
}

</mosaic_0001>

<bundles_post_ra>
// kernel: tpu_custom_call.1
= control target key start
LH: loop header
LB: loop body
LE: loop exit
PB: predicated region body
PF: predicated region fallthrough
CT: control target
= control target key end

     0   :  { %s1091_s0 = inlined_call_operand.hbm [shape: f32[2,8,32], index: 0, kind: input, shape index: {}]   ;;  %s1092_s1 = inlined_call_operand.hbm [shape: f32[2,1,64], index: 1, kind: input, shape index: {}]   ;;  %s1093_s2 = inlined_call_operand.hbm [shape: f32[32,128], index: 2, kind: input, shape index: {}]   ;;  %s1094_s3 = inlined_call_operand.vmem [shape: f32[1,128], index: 3, kind: input, shape index: {}]   ;;  %s1095_s4 = inlined_call_operand.hbm [shape: f32[2,8,128], index: 4, kind: output, shape index: {}]  }
   0x1   :  { %1097 = sst [smem:[#allocation15_spill]] %s1091_s0 }
   0x2   :  { %1098 = sst [smem:[#allocation16_spill]] %s1093_s2 }
   0x3   :  { %9 = vsyncpa [#allocation3], 0 }
   0x4   :  { %11 = vsyncpa [#allocation3 + $0x1], 0 }
   0x5   :  { %12 = vsyncpa [#allocation6], 0 }
   0x6   :  { %14 = vsyncpa [#allocation6 + $0x1], 0 }
   0x7   :  { %15 = vsyncpa [#allocation4], 0 }
   0x8   :  { %17 = vsyncpa [#allocation4 + $0x1], 0  ;;  %s893_s15 = smov 0   ;;  %s895_s16 = smov 0  }
   0x9   :  { %s897_s17 = smov 0   ;;  %s899_s18 = smov 0  }
   0xa   :  { %s901_s19 = smov 0   ;;  %s903_s20 = smov 0  }
   0xb LB: > { %s924_s21 = sadd.s32 4294967295, %s857_s20   ;;  %s567_s22 = sadd.s32 4294967294, %s857_s20   ;;  %s857_s20 = sphi %s903_s20, %s23_s20   ;;  %s853_s19 = sphi %s901_s19, %s1118_s19   ;;  %s849_s18 = sphi %s899_s18, %s1117_s18   ;;  %s845_s17 = sphi %s897_s17, %s1116_s17   ;;  %s841_s16 = sphi %s895_s16, %s1115_s16   ;;  %s837_s15 = sphi %s893_s15, %s1114_s15  }
   0xc   : > { %p64_p0 = scmp.ne.s32.totalorder %s841_s16, %s837_s15  ;;  %p65_p1 = scmp.eq.s32.totalorder %s924_s21, 0 }
   0xd   : > { %p176_p3 = scmp.eq.s32.totalorder %s567_s22, 1  ;;  %p568_p5 = scmp.ge.s32.totalorder %s857_s20, 1 }
   0xe   : > { %p933_p4 = por %p65_p1, %p64_p0  ;;  %p183_p7 = scmp.lt.s32.totalorder %s857_s20, 3 }
   0xf   : > { %p938_p6 = por %p176_p3, %p64_p0  ;;  %s859_s26 = smov [#allocation7]  }
  0x10   : > { %p943_p8 = pnand %p568_p5, %p183_p7  ;;  %s197_s27 = sshll.u32 %s859_s26, 4  ;;  %s198_s27 = int_to_ptr.vmem [resolvable:$true] %s197_s27 }
  0x11   : > { %s1100_s24 = scalar_select %p938_p6, 1, 0 }
  0x12   : > { %p612_p9 = pneg %p943_p8  ;;  %p571_p10 = scmp.ge.s32.totalorder %s857_s20, 2 }
  0x13   : > { %s42_s29 = sadd.s32 1, %s853_s19  ;;  %s698_s30 = scalar_lea.vmem %s198_s27, 512 }
  0x14   : > { %p952_p11 = pnand %p612_p9, %p65_p1  ;;  %p699_p13 = scmp.ne.s32.totalorder %s198_s27, %s698_s30 }
  0x15   : > { %p706_p5 = scmp.lt.s32.totalorder %s198_s27, %s198_s27  ;;  %p707_p7 = scmp.lt.s32.totalorder %s698_s30, %s698_s30 }
  0x16   : > { %p689_p12 = pneg %p952_p11 }
  0x17   : > { %p708_p2 = por %p707_p7, %p706_p5 }
  0x18   : > { %p701_p0 = pnand %p699_p13, %p689_p12 }
  0x1a   : > { %p702_p3 = pneg %p701_p0 }
  0x1c   : > { %p709_p6 = pnand %p708_p2, %p702_p3 }
  0x1e   : > { %712 = shalt.err (!%p709_p6)
}
  0x1f   : > { %s860_s5 = smov 128   ;;  %s861_s6 = smov 8  }
  0x20   : > { %s1103_s2 = sld [smem:[#allocation16_spill]]  ;;  %p44_p2 = scmp.ge.s32.totalorder %s42_s29, 2 }
  0x21   : > { %s51_s9 = sadd.s32 1, %s845_s17  ;;  %p58_p6 = scmp.ne.s32.totalorder %s845_s17, %s841_s16 }
  0x22   : > { %p59_p9 = scmp.eq.s32.totalorder %s857_s20, 0  ;;  %s1120_s29 = smov (%p44_p2, %s42_s29), 0 }
  0x23   : > { %1104 = sst [smem:[#allocation13_spill]] %s1120_s29  ;;  %p1106_p13 = scmp.eq.s32.totalorder %s924_s21, 1 }
  0x24   : > { %p970_p12 = por %p59_p9, %p58_p6  ;;  %s46_s12 = ssub.s32 %s853_s19, %s1120_s29 }
  0x25   : > { %p976_p0 = por %p1106_p13, %p58_p6  ;;  %p49_p3 = scmp.eq.s32.totalorder %s46_s12, 0 }
  0x26   : > { %615 = dma.hbm_to_vmem [thread:$0]  (!%p952_p11), %s1103_s2, 512, %s198_s27, [#allocation6], %s860_s5, %s860_s5, %s861_s6  }
  0x27   : > { %p628_p11 = scmp.lt.s32.totalorder %s857_s20, 2  ;;  %s217_s13 = sand.u32 1, %s845_s17  }
  0x28   : > { %s572_s14 = sshll.u32 %s217_s13, 3  ;;  %s573_s26 = sshll.u32 %s853_s19, 7 }
  0x29   : > { %s985_s22 = scalar_select %p49_p3, %s845_s17, %s51_s9  }
  0x2a   : > { %s1109_s0 = sld [smem:[#allocation15_spill]]  ;;  %s221_s5 = scalar_lea.vmem [#allocation2], %s572_s14 }
  0x2b   : > { %1108 = sst [smem:[#allocation14_spill]] %s985_s22  ;;  %s229_s6 = sshll.u32 %s221_s5, 4  ;;  %s230_s6 = int_to_ptr.vmem [resolvable:$true] %s229_s6 }
  0x2c   : > { %p993_p5 = pnand %p628_p11, %p970_p12  ;;  %s236_s8 = sand.u32 1, %s857_s20  }
  0x2d   : > { %s218_s12 = scalar_lea.sflag [#allocation3], %s217_s13  ;;  %s726_s9 = scalar_lea.vmem %s230_s6, 128 }
  0x2e   : > { %p715_p7 = pneg %p993_p5  ;;  %p727_p2 = scmp.ne.s32.totalorder %s230_s6, %s726_s9 }
  0x2f   : > { %s862_s14 = smov [#allocation2]  }
  0x30   : > { %s227_s30 = scalar_lea.hbm %s1109_s0, %s573_s26  ;;  %p729_p6 = pnand %p727_p2, %p715_p7 }
  0x31   : > { %s731_s26 = sshll.u32 %s862_s14, 4  ;;  %s732_s26 = int_to_ptr.vmem [resolvable:$false] %s731_s26 }
  0x32   : > { %p730_p9 = pneg %p729_p6  ;;  %s733_s10 = scalar_lea.vmem %s732_s26, 256 }
  0x33   : > { %p734_p12 = scmp.lt.s32.totalorder %s230_s6, %s732_s26  ;;  %p735_p13 = scmp.lt.s32.totalorder %s733_s10, %s726_s9 }
  0x35   : > { %p736_p11 = por %p735_p13, %p734_p12 }
  0x37   : > { %p737_p3 = pnand %p736_p11, %p730_p9 }
  0x39   : > { %740 = shalt.err (!%p737_p3)
}
  0x3a   : > { %619 = dma.hbm_to_vmem [thread:$0]  (!%p993_p5), %s227_s30, 128, %s230_s6, %s218_s12  }
  0x3b   : > { %s574_s27 = sshll.u32 %s853_s19, 4  ;;  %s239_s28 = scalar_lea.vmem [#allocation5], %s217_s13 }
  0x3c   : > { %s246_s5 = sshll.u32 %s239_s28, 4  ;;  %s244_s29 = scalar_lea.hbm %s1092_s1, %s574_s27  ;;  %s247_s5 = int_to_ptr.vmem [resolvable:$true] %s246_s5 }
  0x3d   : > { %s237_s14 = scalar_lea.sflag [#allocation6], %s236_s8  ;;  %s754_s22 = scalar_lea.vmem %s247_s5, 16 }
  0x3e   : > { %p755_p2 = scmp.ne.s32.totalorder %s247_s5, %s754_s22  ;;  %s863_s9 = smov [#allocation5]  }
  0x3f   : > { %s759_s26 = sshll.u32 %s863_s9, 4  ;;  %s760_s26 = int_to_ptr.vmem [resolvable:$false] %s759_s26 }
  0x40   : > { %p757_p6 = pnand %p755_p2, %p715_p7  ;;  %s761_s10 = scalar_lea.vmem %s760_s26, 32 }
  0x41   : > { %p762_p12 = scmp.lt.s32.totalorder %s247_s5, %s760_s26  ;;  %p763_p13 = scmp.lt.s32.totalorder %s761_s10, %s754_s22 }
  0x42   : > { %p758_p9 = pneg %p757_p6 }
  0x43   : > { %p764_p11 = por %p763_p13, %p762_p12 }
  0x45   : > { %p765_p3 = pnand %p764_p11, %p758_p9 }
  0x47   : > { %768 = shalt.err (!%p765_p3)
}
  0x48   : > { %622 = dma.hbm_to_vmem [thread:$0]  (!%p993_p5), %s244_s29, 16, %s247_s5, %s237_s14  }
  0x49   : > { %255 = sbr.rel (%p943_p8) target bundleno = 464 (0x1d0), region = 36  ;;  %s1017_s0 = sand.u32 (!%p943_p8), 1, %s841_s16  }
  0x4a   : > { %s576_s2 = sshll.u32 (!%p943_p8), %s1017_s0, 3  ;;  %s258_s13 = scalar_lea.sflag (!%p943_p8), [#allocation3], %s1017_s0 }
  0x4b   : > { %s261_s22 = scalar_lea.vmem (!%p943_p8), [#allocation2], %s576_s2 }
  0x4e   : > { %820 = dma.done.wait (%p933_p4), %s258_s13, 128  }
  0x4f   : > { %822 = vsyncadd (%p933_p4), %s258_s13, 4294967168  ;;  %s266_s25 = sand.u32 1, %s924_s21   ;;  %s269_s30 = scalar_lea.vmem [#allocation5], %s1017_s0 }
  0x50   : > { %s267_s29 = scalar_lea.sflag [#allocation6], %s266_s25 }
  0x51   : > { %824 = dma.done.wait (%p933_p4), %s267_s29, 16  }
  0x52   : > { %826 = vsyncadd (%p933_p4), %s267_s29, 4294967280 }
  0x53   : > { %828 = dma.done.wait (%p65_p1), [#allocation6], 512  }
  0x54   : > { %830 = vsyncadd (%p65_p1), [#allocation6], 4294966784  ;;  %vm309_vm0 = vcmask 261120   ;;  %v308_v0 = vld [vmem:[%s261_s22] sm:$0xff]  ;;  %s864_s6 = smov 96   ;;  %v865_v6 = vmov 0.0  }
  0x55   : > { %v579_v1 = vld [vmem:[%s269_s30] ss:$0 sm:$0xff]  ;;  %v310_v2 = vsel %vm309_vm0, %v308_v0, 0.0  ;;  %v313_v3 = vmul.f32 %v308_v0, %v308_v0  ;;  %v341_v5 = vld [vmem:[#allocation7 + $0x18] sm:$0xff]  ;;  %591 = vmatprep.subr.mxu0 %v865_v6  ;;  %v340_v7 = vld [vmem:[#allocation7 + $0x10] sm:$0xff]  ;;  %vm866_vm1 = vmmov 0  }
  0x56   : > { %334 = vrot.lane.b32.xlu1 %v579_v1, %s864_s6  ;;  %311 = vadd.xlane.f32.xlu0 %v310_v2  ;;  %v339_v8 = vld [vmem:[#allocation7 + $0x8] sm:$0xff]  ;;  %v338_v9 = vld [vmem:[#allocation7] sm:$0xff]  ;;  %s583_s7 = sshll.u32 %s849_s18, 7  ;;  %s304_s8 = scalar_lea.vmem [#allocation8], %s576_s2 }
  0x57   : > { %v314_v4 = vsel %vm309_vm0, %v313_v3, 0.0  ;;  %592 = vmatpush3.msra.mxu0 %v341_v5  ;;  %599 = vmatprep.mubr.msk.f32.mxu0 %vm866_vm1, %v865_v6  ;;  %v580_v24 = vld [vmem:[%s1094_s3] ss:$0 sm:$0xff]  ;;  %s439_s12 = sshll.u32 %s304_s8, 4  ;;  %s1049_s5 = scalar_lea.hbm %s1095_s4, %s583_s7  ;;  %s440_s12 = int_to_ptr.vmem [resolvable:$true] %s439_s12 }
  0x58   : > { %593 = vmatprep.subr.mxu0 %v865_v6  ;;  %s424_s14 = scalar_lea.sflag [#allocation4], %s1017_s0  ;;  %s769_s9 = scalar_lea.vmem %s440_s12, 128 }
  0x59   : > { %594 = vmatpush3.msra.mxu0 %v340_v7  ;;  %p770_p1 = scmp.ne.s32.totalorder %s440_s12, %s769_s9  ;;  %s867_s18 = smov [#allocation8]  }
  0x5a   : > { %315 = vadd.xlane.f32.xlu0 %v314_v4  ;;  %595 = vmatprep.subr.mxu0 %v865_v6  ;;  %s773_s26 = sshll.u32 %s867_s18, 4  ;;  %s774_s26 = int_to_ptr.vmem [resolvable:$false] %s773_s26 }
  0x5b   : > { %596 = vmatpush3.msra.mxu0 %v339_v8  ;;  %p771_p4 = pnand %p770_p1, %p976_p0  ;;  %s775_s10 = scalar_lea.vmem %s774_s26, 256 }
  0x5c   : > { %597 = vmatprep.subr.mxu0 %v865_v6  ;;  %p776_p5 = scmp.lt.s32.totalorder %s440_s12, %s774_s26  ;;  %p777_p7 = scmp.lt.s32.totalorder %s775_s10, %s769_s9 }
  0x5d   : > { %598 = vmatpush3.msra.mxu0 %v338_v9  ;;  %p772_p8 = pneg %p771_p4 }
  0x5e   : > { %p778_p2 = por %p777_p7, %p776_p5 }
  0x60   : > { %p779_p6 = pnand %p778_p2, %p772_p8 }
  0xc8   : > { %v335_v21 = vpop.permute.xlu1 %334 }
  0xdf   : > { %v312_v10 = vpop.xlane.xlu0 %311 }
  0xe0   : > { %v317_v11 = vmul.f32 0.03125, %v312_v10 }
  0xe2   : > { %v319_v13 = vmul.f32 %v317_v11, %v317_v11  ;;  %v325_v18 = vsub.f32 %v308_v0, %v317_v11 }
  0xe3   : > { %v316_v12 = vpop.xlane.xlu0 %315 }
  0xe4   : > { %v318_v14 = vmul.f32 0.03125, %v316_v12 }
  0xe6   : > { %v320_v15 = vsub.f32 %v318_v14, %v319_v13 }
  0xe8   : > { %v321_v16 = vmax.f32 %v320_v15, 0.0 }
  0xea   : > { %v322_v17 = vadd.f32 1e-05, %v321_v16 }
  0xec   : > { %685 = vrsqrt.f32 %v322_v17 }
  0xf9   : > { %v686_v19 = vpop.eup %685 }
  0xfa   : > { %v326_v20 = vmul.f32 %v686_v19, %v325_v18 }
  0xfc   : > { %v333_v22 = vmul.f32 %v579_v1, %v326_v20 }
  0xfe   : > { %v337_v23 = vadd.f32 %v335_v21, %v333_v22 }
 0x100   : > { %600 = vmatmul.mubr.msk.f32.vlgmr.msra.gmra.mxu0 %vm309_vm0, %v337_v23 }
 0x1c0   : > { %v418_v25 = vpop.f32.mrf.mxu0 }
 0x1c1   : > { %v419_v26 = vadd.f32 %v580_v24, %v418_v25 }
 0x1c2   : > { %v601_v27 = vpop.f32.mrf.mxu0 }
 0x1c3   : > { %422 = vst [vmem:[%s304_s8] sm:$0xff] %v419_v26 }
 0x1c4   : > { %782 = shalt.err (!%p779_p6)
}
 0x1c5   : > { %s783_s2 = scalar_lea.hbm %s1049_s5, 128  ;;  %s787_s22 = scalar_lea.hbm %s1095_s4, 256 }
 0x1c6   : > { %p784_p9 = scmp.ne.s32.totalorder %s1049_s5, %s783_s2  ;;  %p788_p11 = scmp.lt.s32.totalorder %s1049_s5, %s1095_s4 }
 0x1c7   : > { %p789_p3 = scmp.lt.s32.totalorder %s787_s22, %s783_s2 }
 0x1c8   : > { %p785_p12 = pnand %p784_p9, %p976_p0 }
 0x1c9   : > { %p790_p1 = por %p789_p3, %p788_p11 }
 0x1ca   : > { %p786_p13 = pneg %p785_p12 }
 0x1cc   : > { %p791_p4 = pnand %p790_p1, %p786_p13 }
 0x1ce   : > { %794 = shalt.err (!%p791_p4)
}
 0x1cf   : > { %610 = dma.vmem_to_hbm [thread:$0]  (%p976_p0), %s440_s12, 128, %s1049_s5, %s424_s14  }
 0x1d0 PF: > { %s451_s30 = sand.u32 1, %s837_s15   ;;  %p1111_p8 = scmp.ne.s32.totalorder %s1100_s24, 0 }
 0x1d1   : > { %s452_s6 = scalar_lea.sflag [#allocation4], %s451_s30 }
 0x1d2   : > { %p624_p5 = pnand %p571_p10, %p1111_p8 }
 0x1d4   : > { %p625_p7 = pneg %p624_p5 }
 0x1d6   : > { %832 = dma.done.wait (%p625_p7), %s452_s6, 128  }
 0x1d7   : > { %834 = vsyncadd (%p625_p7), %s452_s6, 4294967168  ;;  %s23_s20 = sadd.s32 1, %s857_s20   ;;  %s1112_s11 = sld [smem:[#allocation14_spill]] }
 0x1d8   : > { %p20_p2 = scmp.ge.s32.totalorder %s23_s20, 4   ;;  %s1113_s21 = sld [smem:[#allocation13_spill]] }
 0x1d9   : > { %s1114_s15 = smov %s841_s16  ;;  %s1115_s16 = smov %s845_s17 }
 0x1da   : > { %s1117_s18 = smov %s853_s19  ;;  %22 = sbr.rel (!%p20_p2) target bundleno = 11 (0xb), region = 102 }
 0x1dd   : > { %s1116_s17 = smov %s1112_s11 }
 0x1de   : > { %s1118_s19 = smov %s1113_s21 }
 0x1df   :  { %457 = vsyncpa [#allocation3], 1 }
 0x1e0   :  { %459 = vsyncpa [#allocation3 + $0x1], 1 }
 0x1e1   :  { %460 = vsyncpa [#allocation6], 1 }
 0x1e2   :  { %462 = vsyncpa [#allocation6 + $0x1], 1 }
 0x1e3   :  { %463 = vsyncpa [#allocation4], 1 }
 0x1e4   :  { %465 = vsyncpa [#allocation4 + $0x1], 1 }

</bundles_post_ra>
